<compile_context>
chip_gen: v7x
topology: tpu7x:2x2x1
jax: 0.10.0
libtpu: 0.0.40
codegen_flags: <defaults>
</compile_context>

<pallas_src>
import functools

import jax
import jax.numpy as jnp
import numpy as np
from jax.experimental import pallas as pl
from jax.experimental.pallas import tpu as pltpu


def _round_up(n, m):
    return ((n + m - 1) // m) * m


def _device_kind():
    try:
        return jax.devices()[0].device_kind.lower()
    except Exception:
        return ""


def _num_tensorcores(kind):
    # v7x has 2 TensorCores per chip; earlier generations expose 1.
    return 2 if "v7" in kind else 1


def _act_dtype(kind):
    # v6e / v7x VALUs run packed bf16; v5e (and older) have no bf16 VALU.
    return jnp.bfloat16 if ("v6" in kind or "v7" in kind) else jnp.float32


def _pick_bm(B, num_cores=1, max_bm=1024):
    """Smallest grid (fewest steps) whose block rows are a multiple of 8 and
    <= max_bm; on 2-TC chips the number of steps is forced to be even."""
    if B % 8 != 0:
        return B                                  # ragged tiny batch: one block
    if num_cores <= 1 and B <= max_bm:
        return B                                  # single TC: one big block
    n = num_cores if num_cores > 1 else 1
    while n * 8 <= B:
        if B % n == 0:
            bm = B // n
            if bm % 8 == 0 and bm <= max_bm:
                return bm
        n += num_cores if num_cores > 1 else 1
    return B                                      # fallback: single block


def _make_actor_kernel(max_action, act_dtype):
    neg_slope = 0.01                               # F.leaky_relu default
    ma = float(max_action)

    def actor_kernel(x_ref,                        # [bm, state_dim]  f32
                     w1_ref, b1_ref,               # [S, H1p] bf16, [1, H1p] f32
                     w2_ref, b2_ref,               # [H1p,H2p] bf16, [1, H2p] f32
                     w3_ref, b3_ref,               # [H2p,ADp] bf16, [1, ADp] f32
                     o_ref):                       # [bm, ADp]        f32
        # Matmul operands in bf16, accumulation in f32.
        x = x_ref[...].astype(jnp.bfloat16)

        h1 = jnp.dot(x, w1_ref[...], preferred_element_type=jnp.float32) + b1_ref[...]
        h1 = h1.astype(act_dtype)
        h1 = jnp.maximum(h1, neg_slope * h1)       # leaky_relu

        h2 = jnp.dot(h1.astype(jnp.bfloat16), w2_ref[...],
                     preferred_element_type=jnp.float32) + b2_ref[...]
        h2 = h2.astype(act_dtype)
        h2 = jnp.maximum(h2, neg_slope * h2)       # leaky_relu

        h3 = jnp.dot(h2.astype(jnp.bfloat16), w3_ref[...],
                     preferred_element_type=jnp.float32) + b3_ref[...]
        # tanh -> EUP, scale -> VPU; both hidden under MXU/DMA slack.
        o_ref[...] = (jnp.tanh(h3) * ma).astype(o_ref.dtype)

    return actor_kernel


def prepare_actor(params, max_action):
    """One-time prep: zero-pad feature dims to multiples of 128, cast weights
    to bf16 (biases stay f32).  Call once at init; do NOT call per-forward."""
    state_dim = params["W1"].shape[0]
    h1, h2 = params["W1"].shape[1], params["W2"].shape[1]
    action_dim = params["W3"].shape[1]
    h1p, h2p, adp = _round_up(h1, 128), _round_up(h2, 128), _round_up(action_dim, 128)

    def padw(w, rows, cols):
        r0, c0 = w.shape
        return jnp.asarray(
            jnp.pad(w, ((0, rows - r0), (0, cols - c0))).astype(jnp.bfloat16))

    def padb(b, cols):
        return jnp.asarray(
            jnp.pad(b, ((0, 0), (0, cols - b.shape[1]))).astype(jnp.float32))

    prepared = {
        "W1": padw(params["W1"], state_dim, h1p), "b1": padb(params["b1"], h1p),
        "W2": padw(params["W2"], h1p, h2p),       "b2": padb(params["b2"], h2p),
        "W3": padw(params["W3"], h2p, adp),       "b3": padb(params["b3"], adp),
    }
    meta = {"state_dim": state_dim, "action_dim": action_dim,
            "h1p": h1p, "h2p": h2p, "adp": adp,
            "max_action": float(max_action)}
    return prepared, meta


def actor_forward(x, prepared, meta, *, bm=None, return_padded=False):
    """x: [B, state_dim] f32.  prepared/meta: from prepare_actor (padded bf16
    weights).  Returns [B, action_dim] f32 (or the padded [B, 128k] block)."""
    B, state_dim = x.shape
    assert state_dim == meta["state_dim"]
    h1p, h2p, adp = meta["h1p"], meta["h2p"], meta["adp"]
    action_dim = meta["action_dim"]

    kind = _device_kind()
    num_cores = _num_tensorcores(kind)
    act_dtype = _act_dtype(kind)

    if bm is None:
        bm = _pick_bm(B, num_cores)
    assert B % bm == 0

    kernel = _make_actor_kernel(meta["max_action"], act_dtype)

    # Weights / biases live whole in VMEM (constant index_map -> resident
    # across grid steps); only the batch axis of x / out is tiled.
    const_spec = lambda shape: pl.BlockSpec(shape, lambda i: (0, 0))

    out_padded = pl.pallas_call(
        kernel,
        out_shape=jax.ShapeDtypeStruct((B, adp), jnp.float32),
        grid_spec=pltpu.PrefetchScalarGridSpec(
            num_scalar_prefetch=0,
            grid=(B // bm,),
            in_specs=[
                pl.BlockSpec((bm, state_dim), lambda i: (i, 0)),  # x
                const_spec((state_dim, h1p)),                     # W1
                const_spec((1, h1p)),                             # b1
                const_spec((h1p, h2p)),                           # W2
                const_spec((1, h2p)),                             # b2
                const_spec((h2p, adp)),                           # W3
                const_spec((1, adp)),                             # b3
            ],
            out_specs=pl.BlockSpec((bm, adp), lambda i: (i, 0)),
        ),
        compiler_params=pltpu.CompilerParams(
            dimension_semantics=("parallel",)),
    )(x, prepared["W1"], prepared["b1"], prepared["W2"], prepared["b2"],
      prepared["W3"], prepared["b3"])

    if return_padded:
        return out_padded            # consumer slices lazily / fuses the slice
    return out_padded[:, :action_dim]


# ----------------------------- init & references -----------------------------

def xavier_normal(key, fan_in, fan_out):
    # torch.nn.init.xavier_normal_: std = sqrt(2 / (fan_in + fan_out))
    std = float(np.sqrt(2.0 / (fan_in + fan_out)))
    return jax.random.normal(key, (fan_in, fan_out), dtype=jnp.float32) * std


def init_actor_params(key, state_dim, action_dim):
    k1, k2, k3, k4, k5, k6 = jax.random.split(key, 6)

    # PyTorch Linear bias default: U(-1/sqrt(fan_in), 1/sqrt(fan_in))
    def bias(k, fan_in, fan_out):
        bound = 1.0 / float(np.sqrt(fan_in))
        return jax.random.uniform(k, (1, fan_out), minval=-bound, maxval=bound,
                                  dtype=jnp.float32)

    return {
        "W1": xavier_normal(k1, state_dim, 400),
        "b1": bias(k2, state_dim, 400),
        "W2": xavier_normal(k3, 400, 300),
        "b2": bias(k4, 400, 300),
        "W3": xavier_normal(k5, 300, action_dim),
        "b3": bias(k6, 300, action_dim),
    }


def actor_ref_mirror(x, params, max_action, act_dtype):
    """Pure-JAX reference mirroring the kernel's bf16-matmul / f32-accumulate
    path (and its activation dtype).  Authoritative correctness check."""
    def lrelu(v):
        v = v.astype(act_dtype)
        return jnp.maximum(v, 0.01 * v)

    def dot(a, w):
        return jnp.dot(a.astype(jnp.bfloat16), w.astype(jnp.bfloat16),
                       preferred_element_type=jnp.float32)

    h = lrelu(dot(x, params["W1"]) + params["b1"])
    h = lrelu(dot(h, params["W2"]) + params["b2"])
    return jnp.tanh(dot(h, params["W3"]) + params["b3"]) * max_action


def actor_ref_f32(x, params, max_action):
    """Exact-f32 PyTorch-equivalent forward (gross sanity check only)."""
    lrelu = lambda v: jnp.maximum(v, 0.01 * v)
    h = lrelu(x @ params["W1"] + params["b1"])
    h = lrelu(h @ params["W2"] + params["b2"])
    return jnp.tanh(h @ params["W3"] + params["b3"]) * max_action


if __name__ == "__main__":
    state_dim, action_dim, max_action = 16, 4, 2.0
    batch = 8

    key = jax.random.PRNGKey(0)
    kx, kp = jax.random.split(key)
    x = jax.random.normal(kx, (batch, state_dim), dtype=jnp.float32)
    params = init_actor_params(kp, state_dim, action_dim)

    # One-time padding / bf16 cast of the weights (hoisted out of the hot path).
    prepared, meta = prepare_actor(params, max_action)
    prepared = jax.tree_util.tree_map(jax.block_until_ready, prepared)

    fwd = jax.jit(functools.partial(actor_forward, prepared=prepared, meta=meta))
    out = jax.block_until_ready(fwd(x))

    assert out.shape == (batch, action_dim)

    # Tight check against a reference mirroring the kernel's numeric path.
    kind = _device_kind()
    ref_mirror = actor_ref_mirror(x, params, max_action, _act_dtype(kind))
    np.testing.assert_allclose(np.asarray(out), np.asarray(ref_mirror),
                               rtol=2e-2, atol=2e-2)

    # Gross sanity check vs the exact f32 forward (bf16 matmuls deviate a bit).
    ref_f32 = actor_ref_f32(x, params, max_action)
    np.testing.assert_allclose(np.asarray(out), np.asarray(ref_f32), atol=0.25)

    print("KERNEL_OK")
</pallas_src>

<mosaic_0001>
module attributes {stable_mosaic.version = 11 : i64} {
  func.func @actor_kernel(%arg0: i32, %arg1: memref<8x16xf32, #tpu.memory_space<vmem>>, %arg2: memref<16x512xbf16, #tpu.memory_space<vmem>>, %arg3: memref<1x512xf32, #tpu.memory_space<vmem>>, %arg4: memref<512x384xbf16, #tpu.memory_space<vmem>>, %arg5: memref<1x384xf32, #tpu.memory_space<vmem>>, %arg6: memref<384x128xbf16, #tpu.memory_space<vmem>>, %arg7: memref<1x128xf32, #tpu.memory_space<vmem>>, %arg8: memref<8x128xf32, #tpu.memory_space<vmem>>) attributes {dimension_semantics = [#tpu.dimension_semantics<parallel>], iteration_bounds = array<i64: 1>, scalar_prefetch = 0 : i64, scratch_operands = 0 : i64, tpu.core_type = #tpu.core_type<tc>, window_params = [{transform_indices = @transform_0, window_bounds = array<i64: 8, 16>}, {pipeline_mode = #tpu.pipeline_mode<synchronous>, transform_indices = @transform_1, window_bounds = array<i64: 16, 512>}, {pipeline_mode = #tpu.pipeline_mode<synchronous>, transform_indices = @transform_2, window_bounds = array<i64: 1, 512>}, {pipeline_mode = #tpu.pipeline_mode<synchronous>, transform_indices = @transform_3, window_bounds = array<i64: 512, 384>}, {pipeline_mode = #tpu.pipeline_mode<synchronous>, transform_indices = @transform_4, window_bounds = array<i64: 1, 384>}, {pipeline_mode = #tpu.pipeline_mode<synchronous>, transform_indices = @transform_5, window_bounds = array<i64: 384, 128>}, {pipeline_mode = #tpu.pipeline_mode<synchronous>, transform_indices = @transform_6, window_bounds = array<i64: 1, 128>}, {transform_indices = @transform_7, window_bounds = array<i64: 8, 128>}]} {
    %c0 = arith.constant 0 : index
    %c0_0 = arith.constant 0 : index
    %0 = vector.load %arg1[%c0, %c0_0] : memref<8x16xf32, #tpu.memory_space<vmem>>, vector<8x16xf32>
    %1 = arith.truncf %0 : vector<8x16xf32> to vector<8x16xbf16>
    %c0_1 = arith.constant 0 : index
    %c0_2 = arith.constant 0 : index
    %2 = vector.load %arg2[%c0_1, %c0_2] : memref<16x512xbf16, #tpu.memory_space<vmem>>, vector<16x512xbf16>
    %cst = arith.constant dense<0.000000e+00> : vector<8x512xf32>
    %3 = tpu.matmul %1, %2, %cst {dimension_numbers = #tpu.dot_dimension_numbers<[1], [0], [0], [1], [0, 0, 1, 1], [], []>} : vector<8x16xbf16>, vector<16x512xbf16>, vector<8x512xf32> -> vector<8x512xf32>
    %c0_3 = arith.constant 0 : index
    %c0_4 = arith.constant 0 : index
    %4 = vector.load %arg3[%c0_3, %c0_4] : memref<1x512xf32, #tpu.memory_space<vmem>>, vector<1x512xf32>
    %5 = vector.broadcast %4 : vector<1x512xf32> to vector<8x512xf32>
    %6 = arith.addf %3, %5 : vector<8x512xf32>
    %cst_5 = arith.constant 0.00999999977 : f32
    %7 = vector.broadcast %cst_5 : f32 to vector<8x512xf32>
    %8 = arith.mulf %7, %6 : vector<8x512xf32>
    %9 = arith.maximumf %6, %8 : vector<8x512xf32>
    %10 = arith.truncf %9 : vector<8x512xf32> to vector<8x512xbf16>
    %c0_6 = arith.constant 0 : index
    %c0_7 = arith.constant 0 : index
    %11 = vector.load %arg4[%c0_6, %c0_7] : memref<512x384xbf16, #tpu.memory_space<vmem>>, vector<512x384xbf16>
    %cst_8 = arith.constant dense<0.000000e+00> : vector<8x384xf32>
    %12 = tpu.matmul %10, %11, %cst_8 {dimension_numbers = #tpu.dot_dimension_numbers<[1], [0], [0], [1], [0, 0, 1, 1], [], []>} : vector<8x512xbf16>, vector<512x384xbf16>, vector<8x384xf32> -> vector<8x384xf32>
    %c0_9 = arith.constant 0 : index
    %c0_10 = arith.constant 0 : index
    %13 = vector.load %arg5[%c0_9, %c0_10] : memref<1x384xf32, #tpu.memory_space<vmem>>, vector<1x384xf32>
    %14 = vector.broadcast %13 : vector<1x384xf32> to vector<8x384xf32>
    %15 = arith.addf %12, %14 : vector<8x384xf32>
    %cst_11 = arith.constant 0.00999999977 : f32
    %16 = vector.broadcast %cst_11 : f32 to vector<8x384xf32>
    %17 = arith.mulf %16, %15 : vector<8x384xf32>
    %18 = arith.maximumf %15, %17 : vector<8x384xf32>
    %19 = arith.truncf %18 : vector<8x384xf32> to vector<8x384xbf16>
    %c0_12 = arith.constant 0 : index
    %c0_13 = arith.constant 0 : index
    %20 = vector.load %arg6[%c0_12, %c0_13] : memref<384x128xbf16, #tpu.memory_space<vmem>>, vector<384x128xbf16>
    %cst_14 = arith.constant dense<0.000000e+00> : vector<8x128xf32>
    %21 = tpu.matmul %19, %20, %cst_14 {dimension_numbers = #tpu.dot_dimension_numbers<[1], [0], [0], [1], [0, 0, 1, 1], [], []>} : vector<8x384xbf16>, vector<384x128xbf16>, vector<8x128xf32> -> vector<8x128xf32>
    %c0_15 = arith.constant 0 : index
    %c0_16 = arith.constant 0 : index
    %22 = vector.load %arg7[%c0_15, %c0_16] : memref<1x128xf32, #tpu.memory_space<vmem>>, vector<1x128xf32>
    %23 = vector.broadcast %22 : vector<1x128xf32> to vector<8x128xf32>
    %24 = arith.addf %21, %23 : vector<8x128xf32>
    %25 = math.tanh %24 : vector<8x128xf32>
    %cst_17 = arith.constant 2.000000e+00 : f32
    %26 = vector.broadcast %cst_17 : f32 to vector<8x128xf32>
    %27 = arith.mulf %25, %26 : vector<8x128xf32>
    %c0_18 = arith.constant 0 : index
    %c0_19 = arith.constant 0 : index
    %28 = vector.load %arg8[%c0_18, %c0_19] : memref<8x128xf32, #tpu.memory_space<vmem>>, vector<8x128xf32>
    tpu.vector_store %arg8[%c0_18, %c0_19], %27 {strides = array<i32>} : memref<8x128xf32, #tpu.memory_space<vmem>>, vector<8x128xf32>,
    return
  }
  func.func @transform_0(%arg0: i32) -> (i32, i32) {
    %c0_i32 = arith.constant 0 : i32
    %c0_i32_0 = arith.constant 0 : i32
    return %arg0, %c0_i32 : i32, i32
  }
  func.func @transform_1(%arg0: i32) -> (i32, i32) {
    %c0_i32 = arith.constant 0 : i32
    %c0_i32_0 = arith.constant 0 : i32
    %c0_i32_1 = arith.constant 0 : i32
    return %c0_i32, %c0_i32_0 : i32, i32
  }
  func.func @transform_2(%arg0: i32) -> (i32, i32) {
    %c0_i32 = arith.constant 0 : i32
    %c0_i32_0 = arith.constant 0 : i32
    %c0_i32_1 = arith.constant 0 : i32
    return %c0_i32, %c0_i32_0 : i32, i32
  }
  func.func @transform_3(%arg0: i32) -> (i32, i32) {
    %c0_i32 = arith.constant 0 : i32
    %c0_i32_0 = arith.constant 0 : i32
    %c0_i32_1 = arith.constant 0 : i32
    return %c0_i32, %c0_i32_0 : i32, i32
  }
  func.func @transform_4(%arg0: i32) -> (i32, i32) {
    %c0_i32 = arith.constant 0 : i32
    %c0_i32_0 = arith.constant 0 : i32
    %c0_i32_1 = arith.constant 0 : i32
    return %c0_i32, %c0_i32_0 : i32, i32
  }
  func.func @transform_5(%arg0: i32) -> (i32, i32) {
    %c0_i32 = arith.constant 0 : i32
    %c0_i32_0 = arith.constant 0 : i32
    %c0_i32_1 = arith.constant 0 : i32
    return %c0_i32, %c0_i32_0 : i32, i32
  }
  func.func @transform_6(%arg0: i32) -> (i32, i32) {
    %c0_i32 = arith.constant 0 : i32
    %c0_i32_0 = arith.constant 0 : i32
    %c0_i32_1 = arith.constant 0 : i32
    return %c0_i32, %c0_i32_0 : i32, i32
  }
  func.func @transform_7(%arg0: i32) -> (i32, i32) {
    %c0_i32 = arith.constant 0 : i32
    %c0_i32_0 = arith.constant 0 : i32
    return %arg0, %c0_i32 : i32, i32
  }
}

</mosaic_0001>

<bundles_post_ra>
// kernel: actor_forward.1
= control target key start
LH: loop header
LB: loop body
LE: loop exit
PB: predicated region body
PF: predicated region fallthrough
CT: control target
= control target key end

     0   :  { %v1678_v1 = vmov 0   ;;  %vm75_vm0 = vcmask 130048   ;;  %v35_v57 = vlaneseq  ;;  %vm1680_vm1 = vmmov 0   ;;  %s2126_s1 = inlined_call_operand.vmem [shape: bf16[16,512], index: 1, kind: input, shape index: {}]   ;;  %s2127_s0 = inlined_call_operand.vmem [shape: f32[8,16], index: 0, kind: input, shape index: {}]   ;;  %s2128_s3 = inlined_call_operand.vmem [shape: bf16[512,384], index: 3, kind: input, shape index: {}]   ;;  %s2129_s2 = inlined_call_operand.vmem [shape: f32[1,512], index: 2, kind: input, shape index: {}]   ;;  %s2130_s5 = inlined_call_operand.vmem [shape: bf16[384,128], index: 5, kind: input, shape index: {}]   ;;  %s2131_s4 = inlined_call_operand.vmem [shape: f32[1,384], index: 4, kind: input, shape index: {}]   ;;  %s2132_s6 = inlined_call_operand.vmem [shape: f32[1,128], index: 6, kind: input, shape index: {}]   ;;  %s2133_s7 = inlined_call_operand.vmem [shape: f32[8,128], index: 7, kind: output, shape index: {}]  }
   0x1   :  { %v1518_v0 = vld [vmem:[%s2126_s1 + $0x4] ss:$16 sps:$4 sm:$0xff]   ;;  %111 = vmatprep.mubr.bf16.mxu0 %v1678_v1  ;;  %152 = vmatprep.mubr.bf16.mxu1 %v1678_v1  ;;  %v1520_v2 = vld [vmem:[%s2126_s1] ss:$16 sps:$4 sm:$0xff]   ;;  %v1521_v5 = vld [vmem:[%s2126_s1 + $0xc] ss:$16 sps:$4 sm:$0xff]  }
   0x2   :  { %v27_v3 = vld [vmem:[%s2127_s0] sm:$0xff]  ;;  %79 = vmatprep.subr.bf16.mxu0 %v1518_v0  ;;  %v1523_v6 = vld [vmem:[%s2126_s1 + $0x8] ss:$16 sps:$4 sm:$0xff]   ;;  %120 = vmatprep.subr.bf16.mxu1 %v1521_v5  ;;  %v1530_v12 = vld [vmem:[%s2128_s3 + $0x30] ss:$12 sps:$4 sm:$0xff]   ;;  %v1886_v58 = vshrl.u32 %v35_v57, 7 }
   0x3   :  { %v28_v4 = vpack.c.bf16 %v27_v3, %v27_v3  ;;  %80 = vmatpush1.bf16.msra.mxu0 %v1520_v2  ;;  %v1524_v7 = vld [vmem:[%s2128_s3] ss:$12 sps:$4 sm:$0xff]   ;;  %v1526_v8 = vld [vmem:[%s2128_s3 + $0x4] ss:$12 sps:$4 sm:$0xff]   ;;  %121 = vmatpush1.bf16.msra.mxu1 %v1523_v6  ;;  %v1529_v9 = vld [vmem:[%s2128_s3 + $0x1c] ss:$12 sps:$4 sm:$0xff]  }
   0x4   :  { %830 = vmatprep.subr.bf16.mxu0 %v1526_v8  ;;  %v1527_v10 = vld [vmem:[%s2128_s3 + $0x18] ss:$12 sps:$4 sm:$0xff]   ;;  %v1532_v11 = vld [vmem:[%s2128_s3 + $0x34] ss:$12 sps:$4 sm:$0xff]   ;;  %v1541_v19 = vld [vmem:[%s2128_s3 + $0x7c] ss:$12 sps:$4 sm:$0xff]  }
   0x5   :  { %v1535_v13 = vld [vmem:[%s2128_s3 + $0x4c] ss:$12 sps:$4 sm:$0xff]   ;;  %v1533_v14 = vld [vmem:[%s2128_s3 + $0x48] ss:$12 sps:$4 sm:$0xff]   ;;  %v1538_v15 = vld [vmem:[%s2128_s3 + $0x64] ss:$12 sps:$4 sm:$0xff]  }
   0x6   :  { %1291 = vmatmul.mubr.msk.bf16.vlgmr.msra.gmra.mrb[0].mxu0 %vm75_vm0, %v28_v4  ;;  %1292 = vmatmul.mubr.msk.bf16.vlgmr.msra.gmra.mrb[0].mxu1 %vm75_vm0, %v28_v4  ;;  %v1551_v16 = vld [vmem:[%s2128_s3 + $0xc8] ss:$12 sps:$4 sm:$0xff]   ;;  %v1536_v18 = vld [vmem:[%s2128_s3 + $0x60] ss:$12 sps:$4 sm:$0xff]   ;;  %v1539_v22 = vld [vmem:[%s2128_s3 + $0x78] ss:$12 sps:$4 sm:$0xff]  }
   0x7   :  { %831 = vmatpush1.bf16.msra.mxu0 %v1524_v7  ;;  %v1552_v17 = vld [vmem:[%s2128_s3 + $0x8] ss:$12 sps:$4 sm:$0xff]   ;;  %1414 = vmatprep.subr.bf16.mxu1 %v1551_v16  ;;  %v1556_v20 = vld [vmem:[%s2128_s3 + $0xe0] ss:$12 sps:$4 sm:$0xff]   ;;  %v1561_v23 = vld [vmem:[%s2128_s3 + $0xf8] ss:$12 sps:$4 sm:$0xff]  }
   0x8   :  { %832 = vmatprep.subr.bf16.mxu0 %v1529_v9  ;;  %1415 = vmatpush3.bf16.msra.mxu1 %v1552_v17  ;;  %v1557_v21 = vld [vmem:[%s2128_s3 + $0x20] ss:$12 sps:$4 sm:$0xff]   ;;  %v1562_v24 = vld [vmem:[%s2128_s3 + $0x38] ss:$12 sps:$4 sm:$0xff]   ;;  %v1566_v26 = vld [vmem:[%s2128_s3 + $0x110] ss:$12 sps:$4 sm:$0xff]  }
   0x9   :  { %1416 = vmatprep.subr.bf16.mxu1 %v1556_v20  ;;  %v1544_v25 = vld [vmem:[%s2128_s3 + $0x94] ss:$12 sps:$4 sm:$0xff]   ;;  %v1567_v27 = vld [vmem:[%s2128_s3 + $0x50] ss:$12 sps:$4 sm:$0xff]   ;;  %v1547_v29 = vld [vmem:[%s2128_s3 + $0xac] ss:$12 sps:$4 sm:$0xff]  }
   0xa   :  { %v1542_v28 = vld [vmem:[%s2128_s3 + $0x90] ss:$12 sps:$4 sm:$0xff]   ;;  %v1571_v30 = vld [vmem:[%s2128_s3 + $0x128] ss:$12 sps:$4 sm:$0xff]   ;;  %v1576_v34 = vld [vmem:[%s2128_s3 + $0x140] ss:$12 sps:$4 sm:$0xff]  }
   0xb   :  { %833 = vmatpush1.bf16.msra.mxu0 %v1527_v10  ;;  %v1572_v31 = vld [vmem:[%s2128_s3 + $0x68] ss:$12 sps:$4 sm:$0xff]   ;;  %v1550_v33 = vld [vmem:[%s2128_s3 + $0xc4] ss:$12 sps:$4 sm:$0xff]   ;;  %v1548_v35 = vld [vmem:[%s2128_s3 + $0xc0] ss:$12 sps:$4 sm:$0xff]  }
   0xc   :  { %834 = vmatprep.subr.bf16.mxu0 %v1532_v11  ;;  %1417 = vmatpush3.bf16.msra.mxu1 %v1557_v21  ;;  %v1545_v32 = vld [vmem:[%s2128_s3 + $0xa8] ss:$12 sps:$4 sm:$0xff]   ;;  %v1577_v36 = vld [vmem:[%s2128_s3 + $0x80] ss:$12 sps:$4 sm:$0xff]   ;;  %v1553_v38 = vld [vmem:[%s2128_s3 + $0xd8] ss:$12 sps:$4 sm:$0xff]  }
   0xd   :  { %1418 = vmatprep.subr.bf16.mxu1 %v1561_v23  ;;  %v1555_v37 = vld [vmem:[%s2128_s3 + $0xdc] ss:$12 sps:$4 sm:$0xff]   ;;  %v1560_v39 = vld [vmem:[%s2128_s3 + $0xf4] ss:$12 sps:$4 sm:$0xff]   ;;  %v1565_v41 = vld [vmem:[%s2128_s3 + $0x10c] ss:$12 sps:$4 sm:$0xff]  }
   0xe   :  { %v1558_v40 = vld [vmem:[%s2128_s3 + $0xf0] ss:$12 sps:$4 sm:$0xff]   ;;  %v1563_v42 = vld [vmem:[%s2128_s3 + $0x108] ss:$12 sps:$4 sm:$0xff]   ;;  %v1568_v44 = vld [vmem:[%s2128_s3 + $0x120] ss:$12 sps:$4 sm:$0xff]  }
   0xf   :  { %835 = vmatpush1.bf16.msra.mxu0 %v1530_v12  ;;  %v1570_v43 = vld [vmem:[%s2128_s3 + $0x124] ss:$12 sps:$4 sm:$0xff]   ;;  %v1575_v45 = vld [vmem:[%s2128_s3 + $0x13c] ss:$12 sps:$4 sm:$0xff]   ;;  %v1580_v47 = vld [vmem:[%s2128_s3 + $0x154] ss:$12 sps:$4 sm:$0xff]  }
  0x10   :  { %836 = vmatprep.subr.bf16.mxu0 %v1535_v13  ;;  %1419 = vmatpush3.bf16.msra.mxu1 %v1562_v24  ;;  %v1573_v46 = vld [vmem:[%s2128_s3 + $0x138] ss:$12 sps:$4 sm:$0xff]   ;;  %v1578_v49 = vld [vmem:[%s2128_s3 + $0x150] ss:$12 sps:$4 sm:$0xff]   ;;  %v1583_v53 = vld [vmem:[%s2128_s3 + $0x168] ss:$12 sps:$4 sm:$0xff]  }
  0x11   :  { %1420 = vmatprep.subr.bf16.mxu1 %v1566_v26  ;;  %v1581_v48 = vld [vmem:[%s2128_s3 + $0x158] ss:$12 sps:$4 sm:$0xff]   ;;  %v1586_v52 = vld [vmem:[%s2128_s3 + $0x170] ss:$12 sps:$4 sm:$0xff]   ;;  %v1591_v56 = vld [vmem:[%s2128_s3 + $0x248] ss:$12 sps:$4 sm:$0xff]  }
  0x12   :  { %v1582_v50 = vld [vmem:[%s2128_s3 + $0x98] ss:$12 sps:$4 sm:$0xff]   ;;  %v1587_v54 = vld [vmem:[%s2128_s3 + $0xb0] ss:$12 sps:$4 sm:$0xff]   ;;  %v37_v59 = vsub.s32 0, %v1886_v58  ;;  %v41_v61 = vsub.s32 1, %v1886_v58 }
  0x13   :  { %837 = vmatpush1.bf16.msra.mxu0 %v1533_v14  ;;  %v1585_v51 = vld [vmem:[%s2128_s3 + $0x16c] ss:$12 sps:$4 sm:$0xff]   ;;  %v1590_v55 = vld [vmem:[%s2128_s3 + $0x184] ss:$12 sps:$4 sm:$0xff]   ;;  %v33_v60 = vld [vmem:[%s2129_s2] sm:$0xf] }
  0x14   :  { %838 = vmatprep.subr.bf16.mxu0 %v1538_v15  ;;  %1421 = vmatpush3.bf16.msra.mxu1 %v1567_v27  ;;  %v49_v62 = vsub.s32 3, %v1886_v58  ;;  %v38_v63 = vrot.slane %v33_v60, %v37_v59  ;;  %v42_v0 = vrot.slane %v33_v60, %v41_v61  ;;  %v1592_v20 = vld [vmem:[%s2128_s3 + $0x188] ss:$12 sps:$4 sm:$0xff]   ;;  %v1596_v24 = vld [vmem:[%s2128_s3 + $0x260] ss:$12 sps:$4 sm:$0xff]  }
  0x15   :  { %1422 = vmatprep.subr.bf16.mxu1 %v1571_v30  ;;  %v1595_v23 = vld [vmem:[%s2128_s3 + $0x19c] ss:$12 sps:$4 sm:$0xff]   ;;  %v1593_v26 = vld [vmem:[%s2128_s3 + $0x198] ss:$12 sps:$4 sm:$0xff]   ;;  %v1597_v27 = vld [vmem:[%s2128_s3 + $0x1a0] ss:$12 sps:$4 sm:$0xff]  }
  0x16   :  { %v50_v2 = vrot.slane %v33_v60, %v49_v62  ;;  %v1598_v30 = vld [vmem:[%s2128_s3 + $0x1b0] ss:$12 sps:$4 sm:$0xff]   ;;  %v1628_v62 = vld [vmem:[%s2128_s3 + $0x240] ss:$12 sps:$4 sm:$0xff]  }
  0x17   :  { %839 = vmatpush1.bf16.msra.mxu0 %v1536_v18  ;;  %v1630_v57 = vld [vmem:[%s2128_s3 + $0x244] ss:$12 sps:$4 sm:$0xff]  }
  0x18   :  { %840 = vmatprep.subr.bf16.mxu0 %v1541_v19  ;;  %1423 = vmatpush3.bf16.msra.mxu1 %v1572_v31  ;;  %v1588_v19 = vld [vmem:[%s2128_s3 + $0x180] ss:$12 sps:$4 sm:$0xff]   ;;  %v1602_v31 = vld [vmem:[%s2128_s3 + $0x1b8] ss:$12 sps:$4 sm:$0xff]  }
  0x19   :  { %1424 = vmatprep.subr.bf16.mxu1 %v1576_v34  ;;  %v45_v34 = vsub.s32 2, %v1886_v58  ;;  %v1669_v58 = vld [vmem:[%s2130_s5 + $0x88] sm:$0xff]  }
  0x1b   :  { %841 = vmatpush1.bf16.msra.mxu0 %v1539_v22 }
  0x1c   :  { %842 = vmatprep.subr.bf16.mxu0 %v1544_v25  ;;  %1425 = vmatpush3.bf16.msra.mxu1 %v1577_v36  ;;  %v1607_v36 = vld [vmem:[%s2128_s3 + $0x1d0] ss:$12 sps:$4 sm:$0xff]  }
  0x1d   :  { %1426 = vmatprep.subr.bf16.mxu1 %v1581_v48  ;;  %v1621_v48 = vld [vmem:[%s2128_s3 + $0x2d8] ss:$12 sps:$4 sm:$0xff]  }
  0x1f   :  { %843 = vmatpush1.bf16.msra.mxu0 %v1542_v28  ;;  %v1600_v28 = vld [vmem:[%s2128_s3 + $0x1b4] ss:$12 sps:$4 sm:$0xff]  }
  0x20   :  { %844 = vmatprep.subr.bf16.mxu0 %v1547_v29  ;;  %1427 = vmatpush3.bf16.msra.mxu1 %v1582_v50  ;;  %v1601_v29 = vld [vmem:[%s2128_s3 + $0x278] ss:$12 sps:$4 sm:$0xff]   ;;  %v1618_v50 = vld [vmem:[%s2128_s3 + $0x210] ss:$12 sps:$4 sm:$0xff]  }
  0x21   :  { %1428 = vmatprep.subr.bf16.mxu1 %v1586_v52  ;;  %v1625_v52 = vld [vmem:[%s2128_s3 + $0x22c] ss:$12 sps:$4 sm:$0xff]  }
  0x23   :  { %845 = vmatpush1.bf16.msra.mxu0 %v1545_v32  ;;  %v1605_v32 = vld [vmem:[%s2128_s3 + $0x1cc] ss:$12 sps:$4 sm:$0xff]  }
  0x24   :  { %846 = vmatprep.subr.bf16.mxu0 %v1550_v33  ;;  %1429 = vmatpush3.bf16.msra.mxu1 %v1587_v54  ;;  %v1606_v33 = vld [vmem:[%s2128_s3 + $0x290] ss:$12 sps:$4 sm:$0xff]  }
  0x25   :  { %1436 = vmatprep.subr.bf16.mxu1 %v1591_v56  ;;  %v1627_v56 = vld [vmem:[%s2128_s3 + $0x230] ss:$12 sps:$4 sm:$0xff]  }
  0x27   :  { %847 = vmatpush1.bf16.msra.mxu0 %v1548_v35  ;;  %v1603_v35 = vld [vmem:[%s2128_s3 + $0x1c8] ss:$12 sps:$4 sm:$0xff]  }
  0x28   :  { %848 = vmatprep.subr.bf16.mxu0 %v1555_v37  ;;  %v1610_v37 = vld [vmem:[%s2128_s3 + $0x1e4] ss:$12 sps:$4 sm:$0xff]  }
  0x2b   :  { %849 = vmatpush1.bf16.msra.mxu0 %v1553_v38  ;;  %v1611_v38 = vld [vmem:[%s2128_s3 + $0x2a8] ss:$12 sps:$4 sm:$0xff]  }
  0x2c   :  { %850 = vmatprep.subr.bf16.mxu0 %v1560_v39  ;;  %v46_v39 = vrot.slane %v33_v60, %v45_v34 }
  0x2f   :  { %851 = vmatpush1.bf16.msra.mxu0 %v1558_v40  ;;  %v1608_v40 = vld [vmem:[%s2128_s3 + $0x1e0] ss:$12 sps:$4 sm:$0xff]  }
  0x30   :  { %852 = vmatprep.subr.bf16.mxu0 %v1565_v41  ;;  %v1612_v41 = vld [vmem:[%s2128_s3 + $0x1e8] ss:$12 sps:$4 sm:$0xff]  }
  0x33   :  { %853 = vmatpush1.bf16.msra.mxu0 %v1563_v42  ;;  %v1615_v42 = vld [vmem:[%s2128_s3 + $0x1fc] ss:$12 sps:$4 sm:$0xff]  }
  0x34   :  { %854 = vmatprep.subr.bf16.mxu0 %v1570_v43  ;;  %v1616_v43 = vld [vmem:[%s2128_s3 + $0x2c0] ss:$12 sps:$4 sm:$0xff]  }
  0x37   :  { %855 = vmatpush1.bf16.msra.mxu0 %v1568_v44 }
  0x38   :  { %856 = vmatprep.subr.bf16.mxu0 %v1575_v45  ;;  %v1613_v45 = vld [vmem:[%s2128_s3 + $0x1f8] ss:$12 sps:$4 sm:$0xff]  }
  0x3b   :  { %857 = vmatpush1.bf16.msra.mxu0 %v1573_v46  ;;  %v1617_v46 = vld [vmem:[%s2128_s3 + $0x200] ss:$12 sps:$4 sm:$0xff]  }
  0x3c   :  { %858 = vmatprep.subr.bf16.mxu0 %v1580_v47  ;;  %v1620_v47 = vld [vmem:[%s2128_s3 + $0x214] ss:$12 sps:$4 sm:$0xff]  }
  0x3f   :  { %859 = vmatpush1.bf16.msra.mxu0 %v1578_v49 }
  0x40   :  { %860 = vmatprep.subr.bf16.mxu0 %v1585_v51  ;;  %v1622_v51 = vld [vmem:[%s2128_s3 + $0x218] ss:$12 sps:$4 sm:$0xff]  }
  0x43   :  { %861 = vmatpush1.bf16.msra.mxu0 %v1583_v53  ;;  %v1626_v53 = vld [vmem:[%s2128_s3 + $0x2f0] ss:$12 sps:$4 sm:$0xff]  }
  0x44   :  { %871 = vmatprep.subr.bf16.mxu0 %v1590_v55  ;;  %v1623_v55 = vld [vmem:[%s2128_s3 + $0x228] ss:$12 sps:$4 sm:$0xff]  }
  0xd9   :  { %v113_v1 = vpop.f32.mrb[0].mxu0  ;;  %v154_v7 = vpop.f32.mrb[0].mxu1 }
  0xda   :  { %v114_v3 = vadd.f32 %v113_v1, %v38_v63  ;;  %v115_v4 = vpop.f32.mrb[1].mxu0  ;;  %v156_v10 = vpop.f32.mrb[1].mxu1  ;;  %v155_v44 = vadd.f32 %v154_v7, %v46_v39  ;;  %v1633_v63 = vld [vmem:[%s2128_s3 + $0x25c] ss:$12 sps:$4 sm:$0xff]   ;;  %v1636_v1 = vld [vmem:[%s2128_s3 + $0x274] ss:$12 sps:$4 sm:$0xff]  }
  0xdb   :  { %v116_v5 = vadd.f32 %v115_v4, %v42_v0  ;;  %v117_v6 = vpop.f32.mrb[2].mxu0  ;;  %v157_v12 = vadd.f32 %v156_v10, %v50_v2  ;;  %v158_v13 = vpop.f32.mrb[2].mxu1  ;;  %v1631_v0 = vld [vmem:[%s2128_s3 + $0x258] ss:$12 sps:$4 sm:$0xff]   ;;  %v1634_v2 = vld [vmem:[%s2128_s3 + $0x270] ss:$12 sps:$4 sm:$0xff]  }
  0xdc   :  { %v161_v8 = vmul.f32 0.01, %v114_v3  ;;  %v118_v9 = vpop.f32.mrb[3].mxu0  ;;  %v159_v15 = vpop.f32.mrb[3].mxu1  ;;  %v163_v49 = vmul.f32 0.01, %v155_v44 }
  0xdd   :  { %v162_v11 = vmul.f32 0.01, %v116_v5  ;;  %v164_v17 = vmul.f32 0.01, %v157_v12  ;;  %v1637_v4 = vld [vmem:[%s2128_s3 + $0x288] ss:$12 sps:$4 sm:$0xff]  }
  0xde   :  { %v165_v14 = vmax.f32 %v114_v3, %v161_v8  ;;  %v167_v54 = vmax.f32 %v155_v44, %v163_v49  ;;  %v1639_v3 = vld [vmem:[%s2128_s3 + $0x28c] ss:$12 sps:$4 sm:$0xff]   ;;  %v1645_v7 = vld [vmem:[%s2128_s3 + $0x2bc] ss:$12 sps:$4 sm:$0xff]   ;;  %v1648_v9 = vld [vmem:[%s2128_s3 + $0x2d4] ss:$12 sps:$4 sm:$0xff]  }
  0xdf   :  { %v166_v16 = vmax.f32 %v116_v5, %v162_v11  ;;  %v168_v21 = vmax.f32 %v157_v12, %v164_v17  ;;  %v1642_v5 = vld [vmem:[%s2128_s3 + $0x2a4] ss:$12 sps:$4 sm:$0xff]   ;;  %v1640_v6 = vld [vmem:[%s2128_s3 + $0x2a0] ss:$12 sps:$4 sm:$0xff]   ;;  %v1649_v12 = vld [vmem:[%s2128_s3 + $0x2e8] ss:$12 sps:$4 sm:$0xff]  }
  0xe0   :  { %v169_v22 = vpack.c.bf16 %v165_v14, %v165_v14  ;;  %v171_v60 = vpack.c.bf16 %v167_v54, %v167_v54  ;;  %v1643_v8 = vld [vmem:[%s2128_s3 + $0x2b8] ss:$12 sps:$4 sm:$0xff]   ;;  %v1646_v10 = vld [vmem:[%s2128_s3 + $0x2d0] ss:$12 sps:$4 sm:$0xff]   ;;  %v1654_v15 = vld [vmem:[%s2130_s5 + $0x48] sm:$0xff]  }
  0xe1   :  { %v170_v18 = vpack.c.bf16 %v166_v16, %v166_v16  ;;  %v172_v25 = vpack.c.bf16 %v168_v21, %v168_v21  ;;  %v1651_v11 = vld [vmem:[%s2128_s3 + $0x2ec] ss:$12 sps:$4 sm:$0xff]   ;;  %v1652_v13 = vld [vmem:[%s2130_s5 + $0x40] sm:$0xff]   ;;  %v1656_v17 = vld [vmem:[%s2130_s5 + $0x50] sm:$0xff]  }
  0xe2   :  { %v1653_v14 = vld [vmem:[%s2130_s5] sm:$0xff]   ;;  %v1655_v16 = vld [vmem:[%s2130_s5 + $0x8] sm:$0xff]  }
  0xe3   :  { %862 = vmatprep.mubr.bf16.mxu0 %v170_v18  ;;  %944 = vmatprep.mubr.bf16.mxu1 %v170_v18  ;;  %v1657_v18 = vld [vmem:[%s2130_s5 + $0x10] sm:$0xff]   ;;  %v1660_v21 = vld [vmem:[%s2130_s5 + $0x60] sm:$0xff]  }
  0xe4   :  { %863 = vmatmul.mubr.bf16.vlgmr.msra.gmra.mrb[4].mxu0 %v169_v22  ;;  %945 = vmatmul.mubr.bf16.vlgmr.msra.gmra.mrb[4].mxu1 %v169_v22  ;;  %v1661_v22 = vld [vmem:[%s2130_s5 + $0x20] sm:$0xff]  }
  0xe5   :  { %872 = vmatpush1.bf16.msra.mxu0 %v1588_v19  ;;  %1437 = vmatpush3.bf16.msra.mxu1 %v1592_v20  ;;  %v1658_v19 = vld [vmem:[%s2130_s5 + $0x58] sm:$0xff]  }
  0xe6   :  { %873 = vmatprep.subr.bf16.mxu0 %v1595_v23  ;;  %1438 = vmatprep.subr.bf16.mxu1 %v1596_v24  ;;  %v1659_v20 = vld [vmem:[%s2130_s5 + $0x18] sm:$0xff]   ;;  %v1662_v23 = vld [vmem:[%s2130_s5 + $0x68] sm:$0xff]  }
  0xe7   :  { %984 = vmatprep.mubr.bf16.mxu1 %v172_v25  ;;  %903 = vmatprep.mubr.bf16.mxu0 %v172_v25  ;;  %v1663_v24 = vld [vmem:[%s2130_s5 + $0x28] sm:$0xff]   ;;  %v1664_v25 = vld [vmem:[%s2130_s5 + $0x70] sm:$0xff]  }
  0xe9   :  { %874 = vmatpush1.bf16.msra.mxu0 %v1593_v26  ;;  %1439 = vmatpush3.bf16.msra.mxu1 %v1597_v27  ;;  %v1665_v26 = vld [vmem:[%s2130_s5 + $0x30] sm:$0xff]   ;;  %v1666_v27 = vld [vmem:[%s2130_s5 + $0x78] sm:$0xff]  }
  0xea   :  { %875 = vmatprep.subr.bf16.mxu0 %v1600_v28  ;;  %1440 = vmatprep.subr.bf16.mxu1 %v1601_v29  ;;  %v1667_v28 = vld [vmem:[%s2130_s5 + $0x38] sm:$0xff]   ;;  %v1679_v29 = vmov 0.0  }
  0xed   :  { %876 = vmatpush1.bf16.msra.mxu0 %v1598_v30  ;;  %1441 = vmatpush3.bf16.msra.mxu1 %v1602_v31 }
  0xee   :  { %877 = vmatprep.subr.bf16.mxu0 %v1605_v32  ;;  %1442 = vmatprep.subr.bf16.mxu1 %v1606_v33 }
  0xf1   :  { %878 = vmatpush1.bf16.msra.mxu0 %v1603_v35  ;;  %1443 = vmatpush3.bf16.msra.mxu1 %v1607_v36  ;;  %v301_v36 = vld [vmem:[%s2131_s4] sm:$0x7] }
  0xf2   :  { %879 = vmatprep.subr.bf16.mxu0 %v1610_v37  ;;  %1444 = vmatprep.subr.bf16.mxu1 %v1611_v38  ;;  %v314_v37 = vrot.slane %v301_v36, %v45_v34 }
  0xf5   :  { %880 = vmatpush1.bf16.msra.mxu0 %v1608_v40  ;;  %1445 = vmatpush3.bf16.msra.mxu1 %v1612_v41 }
  0xf6   :  { %881 = vmatprep.subr.bf16.mxu0 %v1615_v42  ;;  %1446 = vmatprep.subr.bf16.mxu1 %v1616_v43 }
  0xf9   :  { %882 = vmatpush1.bf16.msra.mxu0 %v1613_v45  ;;  %1447 = vmatpush3.bf16.msra.mxu1 %v1617_v46  ;;  %v306_v45 = vrot.slane %v301_v36, %v37_v59  ;;  %v310_v46 = vrot.slane %v301_v36, %v41_v61  ;;  %v1670_v59 = vld [vmem:[%s2130_s5 + $0x90] sm:$0xff]   ;;  %v1671_v61 = vld [vmem:[%s2130_s5 + $0x98] sm:$0xff]  }
  0xfa   :  { %883 = vmatprep.subr.bf16.mxu0 %v1620_v47  ;;  %1448 = vmatprep.subr.bf16.mxu1 %v1621_v48 }
  0xfd   :  { %884 = vmatpush1.bf16.msra.mxu0 %v1618_v50  ;;  %1449 = vmatpush3.bf16.msra.mxu1 %v1622_v51 }
  0xfe   :  { %885 = vmatprep.subr.bf16.mxu0 %v1625_v52  ;;  %1450 = vmatprep.subr.bf16.mxu1 %v1626_v53 }
 0x101   :  { %886 = vmatpush1.bf16.msra.mxu0 %v1623_v55  ;;  %1451 = vmatpush3.bf16.msra.mxu1 %v1627_v56 }
 0x102   :  { %887 = vmatprep.subr.bf16.mxu0 %v1630_v57  ;;  %1458 = vmatprep.subr.bf16.mxu1 %v1652_v13  ;;  %v1668_v57 = vld [vmem:[%s2130_s5 + $0x80] sm:$0xff]  }
 0x104   :  { %985 = vmatmul.mubr.bf16.vlgmr.msra.gmra.mrb[8].mxu1 %v171_v60 }
 0x105   :  { %888 = vmatpush1.bf16.msra.mxu0 %v1628_v62  ;;  %1459 = vmatpush3.bf16.msra.mxu1 %v1653_v14  ;;  %v1672_v62 = vld [vmem:[%s2130_s5 + $0xa0] sm:$0xff]  }
 0x106   :  { %889 = vmatprep.subr.bf16.mxu0 %v1633_v63  ;;  %1460 = vmatprep.subr.bf16.mxu1 %v1654_v15  ;;  %v1673_v63 = vld [vmem:[%s2130_s5 + $0xa8] sm:$0xff]  }
 0x109   :  { %890 = vmatpush1.bf16.msra.mxu0 %v1631_v0  ;;  %1461 = vmatpush3.bf16.msra.mxu1 %v1655_v16  ;;  %v1674_v0 = vld [vmem:[%s2130_s5 + $0xb0] sm:$0xff]  }
 0x10a   :  { %891 = vmatprep.subr.bf16.mxu0 %v1636_v1  ;;  %1462 = vmatprep.subr.bf16.mxu1 %v1656_v17 }
 0x10d   :  { %892 = vmatpush1.bf16.msra.mxu0 %v1634_v2  ;;  %1463 = vmatpush3.bf16.msra.mxu1 %v1657_v18  ;;  %v1675_v2 = vld [vmem:[%s2130_s5 + $0xb8] sm:$0xff]  }
 0x10e   :  { %893 = vmatprep.subr.bf16.mxu0 %v1639_v3  ;;  %1464 = vmatprep.subr.bf16.mxu1 %v1658_v19 }
 0x111   :  { %894 = vmatpush1.bf16.msra.mxu0 %v1637_v4  ;;  %1465 = vmatpush3.bf16.msra.mxu1 %v1659_v20 }
 0x112   :  { %895 = vmatprep.subr.bf16.mxu0 %v1642_v5  ;;  %1466 = vmatprep.subr.bf16.mxu1 %v1660_v21 }
 0x115   :  { %896 = vmatpush1.bf16.msra.mxu0 %v1640_v6  ;;  %1467 = vmatpush3.bf16.msra.mxu1 %v1661_v22 }
 0x116   :  { %897 = vmatprep.subr.bf16.mxu0 %v1645_v7  ;;  %1468 = vmatprep.subr.bf16.mxu1 %v1662_v23 }
 0x119   :  { %898 = vmatpush1.bf16.msra.mxu0 %v1643_v8  ;;  %1469 = vmatpush3.bf16.msra.mxu1 %v1663_v24 }
 0x11a   :  { %899 = vmatprep.subr.bf16.mxu0 %v1648_v9  ;;  %1470 = vmatprep.subr.bf16.mxu1 %v1664_v25 }
 0x11d   :  { %900 = vmatpush1.bf16.msra.mxu0 %v1646_v10  ;;  %1471 = vmatpush3.bf16.msra.mxu1 %v1665_v26  ;;  %v1389_v10 = vld [vmem:[%s2132_s6] ss:$0 sm:$0xff] }
 0x11e   :  { %901 = vmatprep.subr.bf16.mxu0 %v1651_v11  ;;  %1472 = vmatprep.subr.bf16.mxu1 %v1666_v27 }
 0x121   :  { %902 = vmatpush1.bf16.msra.mxu0 %v1649_v12  ;;  %1473 = vmatpush3.bf16.msra.mxu1 %v1667_v28 }
 0x122   :  { %1489 = vmatprep.subr.bf16.mxu1 %v1679_v29 }
 0x124   :  { %904 = vmatmul.mubr.bf16.vlgmr.msra.gmra.mrb[4].mxu0 %v171_v60 }
 0x1b7   :  { %v1430_v30 = vpop.f32.mrb[4].mxu1 }
 0x1b8   :  { %v1431_v31 = vpop.f32.mrb[5].mxu1 }
 0x1b9   :  { %v1432_v32 = vadd.f32 %v1431_v31, %v1430_v30  ;;  %v1433_v33 = vpop.f32.mrb[6].mxu1 }
 0x1ba   :  { %v1434_v35 = vpop.f32.mrb[7].mxu1 }
 0x1bb   :  { %v947_v40 = vadd.f32 %v1432_v32, %v314_v37 }
 0x1d7   :  { %v1452_v38 = vpop.f32.mrb[8].mxu1 }
 0x1d8   :  { %v1453_v39 = vpop.f32.mrb[9].mxu1 }
 0x1d9   :  { %v1454_v41 = vadd.f32 %v1453_v39, %v1452_v38  ;;  %v1455_v42 = vpop.f32.mrb[10].mxu1 }
 0x1da   :  { %v1456_v43 = vpop.f32.mrb[11].mxu1 }
 0x1db   :  { %v987_v44 = vadd.f32 %v1454_v41, %v947_v40 }
 0x1dd   :  { %v994_v1 = vmul.f32 0.01, %v987_v44 }
 0x1df   :  { %v997_v3 = vmax.f32 %v987_v44, %v994_v1 }
 0x1e1   :  { %v1000_v4 = vpack.c.bf16 %v997_v3, %v997_v3 }
 0x1f7   :  { %v905_v47 = vpop.f32.mrb[4].mxu0 }
 0x1f8   :  { %v1509_v48 = vadd.f32 %v905_v47, %v306_v45  ;;  %v907_v49 = vpop.f32.mrb[5].mxu0 }
 0x1f9   :  { %v1510_v50 = vadd.f32 %v907_v49, %v310_v46  ;;  %v909_v51 = vpop.f32.mrb[6].mxu0 }
 0x1fa   :  { %v992_v52 = vmul.f32 0.01, %v1509_v48  ;;  %v910_v34 = vpop.f32.mrb[7].mxu0 }
 0x1fb   :  { %v993_v53 = vmul.f32 0.01, %v1510_v50 }
 0x1fc   :  { %v995_v54 = vmax.f32 %v1509_v48, %v992_v52 }
 0x1fd   :  { %v996_v55 = vmax.f32 %v1510_v50, %v993_v53 }
 0x1fe   :  { %v998_v60 = vpack.c.bf16 %v995_v54, %v995_v54 }
 0x1ff   :  { %v999_v56 = vpack.c.bf16 %v996_v55, %v996_v55 }
 0x201   :  { %1232 = vmatprep.mubr.bf16.mxu1 %v999_v56 }
 0x202   :  { %1233 = vmatmul.mubr.bf16.vlgmr.msra.gmra.mrb[12].mxu1 %v998_v60 }
 0x203   :  { %1490 = vmatpush3.bf16.msra.mxu1 %v1668_v57  ;;  %1505 = vmatprep.mubr.msk.bf16.mxu1 %vm1680_vm1, %v1679_v29 }
 0x204   :  { %1491 = vmatprep.subr.bf16.mxu1 %v1679_v29 }
 0x207   :  { %1492 = vmatpush3.bf16.msra.mxu1 %v1669_v58 }
 0x208   :  { %1493 = vmatprep.subr.bf16.mxu1 %v1679_v29 }
 0x20b   :  { %1494 = vmatpush3.bf16.msra.mxu1 %v1670_v59 }
 0x20c   :  { %1495 = vmatprep.subr.bf16.mxu1 %v1679_v29 }
 0x20f   :  { %1496 = vmatpush3.bf16.msra.mxu1 %v1671_v61 }
 0x210   :  { %1497 = vmatprep.subr.bf16.mxu1 %v1679_v29 }
 0x213   :  { %1498 = vmatpush3.bf16.msra.mxu1 %v1672_v62 }
 0x214   :  { %1499 = vmatprep.subr.bf16.mxu1 %v1679_v29 }
 0x217   :  { %1500 = vmatpush3.bf16.msra.mxu1 %v1673_v63 }
 0x218   :  { %1501 = vmatprep.subr.bf16.mxu1 %v1679_v29 }
 0x21b   :  { %1502 = vmatpush3.bf16.msra.mxu1 %v1674_v0 }
 0x21c   :  { %1503 = vmatprep.subr.bf16.mxu1 %v1679_v29 }
 0x21f   :  { %1504 = vmatpush3.bf16.msra.mxu1 %v1675_v2 }
 0x222   :  { %1506 = vmatmul.mubr.bf16.vlgmr.msra.gmra.mrb[16].mxu1 %v1000_v4 }
 0x2d5   :  { %v1474_v5 = vpop.f32.mrb[12].mxu1 }
 0x2d6   :  { %v1475_v6 = vpop.f32.mrb[13].mxu1 }
 0x2d7   :  { %v1476_v7 = vadd.f32 %v1475_v6, %v1474_v5  ;;  %v1477_v8 = vpop.f32.mrb[14].mxu1 }
 0x2d8   :  { %v1478_v9 = vpop.f32.mrb[15].mxu1 }
 0x2d9   :  { %v1235_v11 = vadd.f32 %v1476_v7, %v1389_v10 }
 0x2f5   :  { %v1274_v12 = vpop.f32.mrb[16].mxu1 }
 0x2f6   :  { %v1275_v13 = vadd.f32 %v1274_v12, %v1235_v11  ;;  %v1507_v14 = vpop.f32.mrb[17].mxu1 }
 0x2f7   :  { %v1277_v15 = vpop.f32.mrb[18].mxu1 }
 0x2f8   :  { %1676 = vtanh.f32 %v1275_v13  ;;  %v1508_v16 = vpop.f32.mrb[19].mxu1 }
 0x302   :  { %v1677_v17 = vpop.eup %1676 }
 0x303   :  { %v1281_v18 = vmul.f32 2.0, %v1677_v17 }
 0x305   :  { %1282 = vst [vmem:[%s2133_s7] sm:$0xff] %v1281_v18 }

</bundles_post_ra>
